<compile_context>
chip_gen: v7x
topology: tpu7x:2x2x1
jax: 0.10.0
libtpu: 0.0.40
codegen_flags: <defaults>
</compile_context>

<pallas_src>
import functools

import numpy as np
import jax
import jax.numpy as jnp
from jax.experimental import pallas as pl
from jax.experimental.pallas import tpu as pltpu

# cfg['eval']['quat_thresh'] is an external config value in the original code;
# fix it deterministically here (degrees).
QUAT_THRESH_DEG = 30.0
_COS_THRESH = float(np.cos(QUAT_THRESH_DEG / 180.0 * np.pi))
_SO3_EPS = 1e-4
_DENOM_EPS = 1e-24          # matches F.normalize's eps=1e-12 on the norm (squared)

_LANE = 128                 # lane (fast) axis width
_SUB_MAX = 256              # max sublane rows/tile -> 4*256*128*4 B = 512 KiB / input block


def quat_loss_kernel(pred_ref, gt_ref, loss_ref, acc_ref,
                     loss_acc, cnt_acc, *, n_true):
    """pred_ref / gt_ref: (4, SUB, LANE) f32 tile — component x dense batch slab."""
    t = pl.program_id(0)
    sub, lane = loss_acc.shape

    @pl.when(t == 0)
    def _init():
        loss_acc[...] = jnp.zeros_like(loss_acc)
        cnt_acc[...] = jnp.zeros_like(cnt_acc)

    p = pred_ref[...]            # (4, SUB, LANE)
    g = gt_ref[...]              # (4, SUB, LANE)

    # Validity mask for zero-padded tail quaternions of the last tile.
    row = jax.lax.broadcasted_iota(jnp.int32, (sub, lane), 0)
    col = jax.lax.broadcasted_iota(jnp.int32, (sub, lane), 1)
    qidx = t * (sub * lane) + row * lane + col
    valid = qidx < n_true

    # ---- SmoothL1Loss (beta=1, mean over 4*N elements) ----
    d = p - g
    ad = jnp.abs(d)
    hub = jnp.where(ad < 1.0, 0.5 * d * d, ad - 0.5)            # (4, SUB, LANE)
    hub_q = jnp.sum(hub, axis=0)                                # (SUB, LANE) per-quat sum

    # ---- so3_relative_angle via the quaternion identity ----
    # trace(R(normalize(p)) R(g)^T) = 4 (p.g)^2 / (|p|^2 |g|^2) - 1
    # (the F.normalize step cancels exactly, so it is dropped).
    dot = jnp.sum(p * g, axis=0)                                # (SUB, LANE)
    pn2 = jnp.sum(p * p, axis=0)
    gn2 = jnp.sum(g * g, axis=0)
    denom = jnp.maximum(pn2 * gn2, _DENOM_EPS)
    inv = pl.reciprocal(denom, approx=True)                     # EUP slot
    inv = inv * (2.0 - denom * inv)                             # 1 Newton step -> ~f32 exact
    rot_trace = 4.0 * (dot * dot) * inv - 1.0
    # TODO(synk): original code raises ValueError if the trace leaves
    # [-1-eps, 3+eps]; a data-dependent host-side exception has no Pallas
    # equivalent — we only clamp (identical values on valid input).
    rot_trace = jnp.clip(rot_trace, -1.0 - _SO3_EPS, 3.0 + _SO3_EPS)
    phi = 0.5 * (rot_trace - 1.0)                               # cosine_angle

    # Fused per-quaternion loss contribution:
    #   loss = sum(hub)/(4N) - sum(phi)/N = (1/N) * sum(0.25*hub_q - phi)
    loss_elem = jnp.where(valid, 0.25 * hub_q - phi, 0.0)
    cnt_elem = jnp.where(valid & (phi > _COS_THRESH), 1.0, 0.0)

    loss_acc[...] += loss_elem
    cnt_acc[...] += cnt_elem

    @pl.when(t == pl.num_programs(0) - 1)
    def _finalize():
        inv_n = 1.0 / float(n_true)
        loss_s = jnp.sum(loss_acc[...], keepdims=True)          # (1, 1)
        cnt_s = jnp.sum(cnt_acc[...], keepdims=True)
        loss_ref[...] = loss_s * inv_n
        acc_ref[...] = cnt_s * inv_n


def quat_loss_pallas_packed(pred_t, gt_t, *, max_sublanes=_SUB_MAX):
    """pred_t, gt_t: (4, N) float32 — kernel-native, component-major layout."""
    pred_t = jnp.asarray(pred_t, jnp.float32)
    gt_t = jnp.asarray(gt_t, jnp.float32)
    n = int(pred_t.shape[1])

    # SUB: multiple of 8, capped; tile = (4, SUB, 128) f32.
    sub = min(int(max_sublanes), max(8, (((n + _LANE - 1) // _LANE) + 7) // 8 * 8))
    cols = sub * _LANE
    nt = (n + cols - 1) // cols
    n_pad = nt * cols
    if n_pad != n:
        pad = ((0, 0), (0, n_pad - n))
        pred_t = jnp.pad(pred_t, pad)
        gt_t = jnp.pad(gt_t, pad)
    pred_r = pred_t.reshape(4, nt, sub, _LANE)   # contiguous reshape (free)
    gt_r = gt_t.reshape(4, nt, sub, _LANE)

    in_spec = pl.BlockSpec((4, None, sub, _LANE), lambda t: (0, t, 0, 0))
    out_spec = pl.BlockSpec((1, 1), lambda t: (0, 0))

    loss, acc = pl.pallas_call(
        functools.partial(quat_loss_kernel, n_true=n),
        out_shape=(jax.ShapeDtypeStruct((1, 1), jnp.float32),
                   jax.ShapeDtypeStruct((1, 1), jnp.float32)),
        grid_spec=pltpu.PrefetchScalarGridSpec(
            num_scalar_prefetch=0,
            grid=(nt,),
            in_specs=[in_spec, in_spec],
            out_specs=(out_spec, out_spec),
            scratch_shapes=[pltpu.VMEM((sub, _LANE), jnp.float32)] * 2,
        ),
        compiler_params=pltpu.CompilerParams(
            dimension_semantics=("arbitrary",)),
    )(pred_r, gt_r)
    return loss[0, 0], acc[0, 0]


def quat_loss_pallas(pred_quat, gt_quat, *, max_sublanes=_SUB_MAX):
    """pred_quat, gt_quat: (N, 4) arrays (PyTorch convention).
    Returns (angle_loss + position_loss, quat_acc) as float32 scalars.

    NOTE: the kernel-native layout is (4, N); producers that can emit it
    directly should call quat_loss_pallas_packed and skip this transpose
    (the transpose is the only extra HBM pass left in this path)."""
    pred_t = jnp.asarray(pred_quat, jnp.float32).T   # (4, N)
    gt_t = jnp.asarray(gt_quat, jnp.float32).T       # (4, N)
    return quat_loss_pallas_packed(pred_t, gt_t, max_sublanes=max_sublanes)


# ---------------- pure-JAX reference (for sanity check only) ----------------
def _quat_to_matrix_ref(q):
    r, i, j, k = q[..., 0], q[..., 1], q[..., 2], q[..., 3]
    two_s = 2.0 / jnp.sum(q * q, axis=-1)
    o = jnp.stack(
        (1 - two_s * (j * j + k * k), two_s * (i * j - k * r), two_s * (i * k + j * r),
         two_s * (i * j + k * r), 1 - two_s * (i * i + k * k), two_s * (j * k - i * r),
         two_s * (i * k - j * r), two_s * (j * k + i * r), 1 - two_s * (i * i + j * j)),
        axis=-1)
    return o.reshape(q.shape[:-1] + (3, 3))


def _quat_loss_ref(pred, gt):
    d = pred - gt
    ad = jnp.abs(d)
    pos = jnp.mean(jnp.where(ad < 1.0, 0.5 * d * d, ad - 0.5))
    npred = pred / jnp.maximum(jnp.linalg.norm(pred, axis=1, keepdims=True), 1e-12)
    r1 = _quat_to_matrix_ref(npred)
    r2 = _quat_to_matrix_ref(gt)
    tr = jnp.sum(r1 * r2, axis=(-2, -1))    # trace(R1 @ R2^T), no matmul precision issues
    tr = jnp.clip(tr, -1.0 - _SO3_EPS, 3.0 + _SO3_EPS)
    phi = 0.5 * (tr - 1.0)
    n = float(pred.shape[0])
    return -jnp.sum(phi) / n + pos, jnp.sum(phi > _COS_THRESH) / n


if __name__ == "__main__":
    key = jax.random.PRNGKey(0)

    # (N, max_sublanes): second case forces multiple grid tiles + tail masking.
    for n, max_sub in ((8, _SUB_MAX), (2500, 8)):
        k1, k2 = jax.random.split(jax.random.fold_in(key, n))
        pred_quat = jax.random.normal(k1, (n, 4), dtype=jnp.float32)
        gt_raw = jax.random.normal(k2, (n, 4), dtype=jnp.float32)
        gt_quat = gt_raw / jnp.linalg.norm(gt_raw, axis=1, keepdims=True)

        loss, acc = quat_loss_pallas(pred_quat, gt_quat, max_sublanes=max_sub)
        jax.block_until_ready((loss, acc))

        ref_loss, ref_acc = _quat_loss_ref(pred_quat, gt_quat)
        np.testing.assert_allclose(np.asarray(loss), np.asarray(ref_loss),
                                   rtol=1e-4, atol=1e-4)
        np.testing.assert_allclose(np.asarray(acc), np.asarray(ref_acc),
                                   rtol=1e-4, atol=1e-4)

    print("KERNEL_OK")
</pallas_src>

<mosaic_0001>
module attributes {stable_mosaic.version = 11 : i64} {
  func.func @quat_loss_kernel(%arg0: i32, %arg1: memref<4x1x8x128xf32, #tpu.memory_space<vmem>>, %arg2: memref<4x1x8x128xf32, #tpu.memory_space<vmem>>, %arg3: memref<1x1xf32, #tpu.memory_space<vmem>>, %arg4: memref<1x1xf32, #tpu.memory_space<vmem>>, %arg5: memref<8x128xf32, #tpu.memory_space<vmem>>, %arg6: memref<8x128xf32, #tpu.memory_space<vmem>>) attributes {dimension_semantics = [#tpu.dimension_semantics<arbitrary>], iteration_bounds = array<i64: 1>, scalar_prefetch = 0 : i64, scratch_operands = 2 : i64, tpu.core_type = #tpu.core_type<tc>, window_params = [{transform_indices = @transform_0, window_bounds = array<i64: 4, 1, 8, 128>}, {transform_indices = @transform_1, window_bounds = array<i64: 4, 1, 8, 128>}, {pipeline_mode = #tpu.pipeline_mode<synchronous>, transform_indices = @transform_2, window_bounds = array<i64: 1, 1>}, {pipeline_mode = #tpu.pipeline_mode<synchronous>, transform_indices = @transform_3, window_bounds = array<i64: 1, 1>}]} {
    %c0_i32 = arith.constant 0 : i32
    %0 = arith.cmpi eq, %arg0, %c0_i32 : i32
    %1 = arith.extui %0 : i1 to i32
    %c0_i32_0 = arith.constant 0 : i32
    %2 = arith.cmpi ne, %1, %c0_i32_0 : i32
    scf.if %2 {
      %cst_37 = arith.constant 0.000000e+00 : f32
      %76 = vector.broadcast %cst_37 : f32 to vector<8x128xf32>
      %c0_38 = arith.constant 0 : index
      %c0_39 = arith.constant 0 : index
      %77 = vector.load %arg5[%c0_38, %c0_39] : memref<8x128xf32, #tpu.memory_space<vmem>>, vector<8x128xf32>
      tpu.vector_store %arg5[%c0_38, %c0_39], %76 {strides = array<i32>} : memref<8x128xf32, #tpu.memory_space<vmem>>, vector<8x128xf32>,
      %cst_40 = arith.constant 0.000000e+00 : f32
      %78 = vector.broadcast %cst_40 : f32 to vector<8x128xf32>
      %c0_41 = arith.constant 0 : index
      %c0_42 = arith.constant 0 : index
      %79 = vector.load %arg6[%c0_41, %c0_42] : memref<8x128xf32, #tpu.memory_space<vmem>>, vector<8x128xf32>
      tpu.vector_store %arg6[%c0_41, %c0_42], %78 {strides = array<i32>} : memref<8x128xf32, #tpu.memory_space<vmem>>, vector<8x128xf32>,
    } else {
    }
    %c0 = arith.constant 0 : index
    %c0_1 = arith.constant 0 : index
    %c0_2 = arith.constant 0 : index
    %c0_3 = arith.constant 0 : index
    %3 = vector.load %arg1[%c0, %c0_1, %c0_2, %c0_3] : memref<4x1x8x128xf32, #tpu.memory_space<vmem>>, vector<4x1x8x128xf32>
    %4 = vector.shape_cast %3 : vector<4x1x8x128xf32> to vector<4x8x128xf32>
    %c0_4 = arith.constant 0 : index
    %c0_5 = arith.constant 0 : index
    %c0_6 = arith.constant 0 : index
    %c0_7 = arith.constant 0 : index
    %5 = vector.load %arg2[%c0_4, %c0_5, %c0_6, %c0_7] : memref<4x1x8x128xf32, #tpu.memory_space<vmem>>, vector<4x1x8x128xf32>
    %6 = vector.shape_cast %5 : vector<4x1x8x128xf32> to vector<4x8x128xf32>
    %7 = tpu.iota {dimensions = array<i32: 0>} : vector<8x128xi32>
    %8 = tpu.iota {dimensions = array<i32: 1>} : vector<8x128xi32>
    %c1024_i32 = arith.constant 1024 : i32
    %9 = arith.muli %arg0, %c1024_i32 : i32
    %c128_i32 = arith.constant 128 : i32
    %10 = vector.broadcast %c128_i32 : i32 to vector<8x128xi32>
    %11 = arith.muli %7, %10 : vector<8x128xi32>
    %12 = vector.broadcast %9 : i32 to vector<8x128xi32>
    %13 = arith.addi %12, %11 : vector<8x128xi32>
    %14 = arith.addi %13, %8 : vector<8x128xi32>
    %c8_i32 = arith.constant 8 : i32
    %15 = vector.broadcast %c8_i32 : i32 to vector<8x128xi32>
    %16 = arith.cmpi slt, %14, %15 : vector<8x128xi32>
    %17 = arith.subf %4, %6 : vector<4x8x128xf32>
    %18 = math.absf %17 : vector<4x8x128xf32>
    %cst = arith.constant 1.000000e+00 : f32
    %19 = vector.broadcast %cst : f32 to vector<4x8x128xf32>
    %20 = arith.cmpf olt, %18, %19 : vector<4x8x128xf32>
    %cst_8 = arith.constant 5.000000e-01 : f32
    %21 = vector.broadcast %cst_8 : f32 to vector<4x8x128xf32>
    %22 = arith.mulf %21, %17 : vector<4x8x128xf32>
    %23 = arith.mulf %22, %17 : vector<4x8x128xf32>
    %cst_9 = arith.constant 5.000000e-01 : f32
    %24 = vector.broadcast %cst_9 : f32 to vector<4x8x128xf32>
    %25 = arith.subf %18, %24 : vector<4x8x128xf32>
    %26 = arith.select %20, %23, %25 : vector<4x8x128xi1>, vector<4x8x128xf32>
    %cst_10 = arith.constant dense<0.000000e+00> : vector<8x128xf32>
    %27 = vector.multi_reduction <add>, %26, %cst_10 [0] : vector<4x8x128xf32> to vector<8x128xf32>
    %28 = arith.mulf %4, %6 : vector<4x8x128xf32>
    %cst_11 = arith.constant dense<0.000000e+00> : vector<8x128xf32>
    %29 = vector.multi_reduction <add>, %28, %cst_11 [0] : vector<4x8x128xf32> to vector<8x128xf32>
    %30 = arith.mulf %4, %4 : vector<4x8x128xf32>
    %cst_12 = arith.constant dense<0.000000e+00> : vector<8x128xf32>
    %31 = vector.multi_reduction <add>, %30, %cst_12 [0] : vector<4x8x128xf32> to vector<8x128xf32>
    %32 = arith.mulf %6, %6 : vector<4x8x128xf32>
    %cst_13 = arith.constant dense<0.000000e+00> : vector<8x128xf32>
    %33 = vector.multi_reduction <add>, %32, %cst_13 [0] : vector<4x8x128xf32> to vector<8x128xf32>
    %34 = arith.mulf %31, %33 : vector<8x128xf32>
    %cst_14 = arith.constant 1.000000e-24 : f32
    %35 = vector.broadcast %cst_14 : f32 to vector<8x128xf32>
    %36 = arith.maximumf %34, %35 : vector<8x128xf32>
    %37 = tpu.reciprocal %36 {approx = true} : vector<8x128xf32> -> vector<8x128xf32>
    %38 = arith.mulf %36, %37 : vector<8x128xf32>
    %cst_15 = arith.constant 2.000000e+00 : f32
    %39 = vector.broadcast %cst_15 : f32 to vector<8x128xf32>
    %40 = arith.subf %39, %38 : vector<8x128xf32>
    %41 = arith.mulf %37, %40 : vector<8x128xf32>
    %42 = arith.mulf %29, %29 : vector<8x128xf32>
    %cst_16 = arith.constant 4.000000e+00 : f32
    %43 = vector.broadcast %cst_16 : f32 to vector<8x128xf32>
    %44 = arith.mulf %43, %42 : vector<8x128xf32>
    %45 = arith.mulf %44, %41 : vector<8x128xf32>
    %cst_17 = arith.constant 1.000000e+00 : f32
    %46 = vector.broadcast %cst_17 : f32 to vector<8x128xf32>
    %47 = arith.subf %45, %46 : vector<8x128xf32>
    %cst_18 = arith.constant -1.000100e+00 : f32
    %cst_19 = arith.constant 3.000100e+00 : f32
    %48 = vector.broadcast %cst_18 : f32 to vector<8x128xf32>
    %49 = arith.maximumf %48, %47 : vector<8x128xf32>
    %50 = vector.broadcast %cst_19 : f32 to vector<8x128xf32>
    %51 = arith.minimumf %50, %49 : vector<8x128xf32>
    %cst_20 = arith.constant 1.000000e+00 : f32
    %52 = vector.broadcast %cst_20 : f32 to vector<8x128xf32>
    %53 = arith.subf %51, %52 : vector<8x128xf32>
    %cst_21 = arith.constant 5.000000e-01 : f32
    %54 = vector.broadcast %cst_21 : f32 to vector<8x128xf32>
    %55 = arith.mulf %54, %53 : vector<8x128xf32>
    %cst_22 = arith.constant 2.500000e-01 : f32
    %56 = vector.broadcast %cst_22 : f32 to vector<8x128xf32>
    %57 = arith.mulf %56, %27 : vector<8x128xf32>
    %58 = arith.subf %57, %55 : vector<8x128xf32>
    %cst_23 = arith.constant 0.000000e+00 : f32
    %59 = vector.broadcast %cst_23 : f32 to vector<8x128xf32>
    %60 = arith.select %16, %58, %59 : vector<8x128xi1>, vector<8x128xf32>
    %cst_24 = arith.constant 0.866025388 : f32
    %61 = vector.broadcast %cst_24 : f32 to vector<8x128xf32>
    %62 = arith.cmpf ogt, %55, %61 : vector<8x128xf32>
    %63 = arith.andi %16, %62 : vector<8x128xi1>
    %cst_25 = arith.constant 1.000000e+00 : f32
    %cst_26 = arith.constant 0.000000e+00 : f32
    %64 = vector.broadcast %cst_25 : f32 to vector<8x128xf32>
    %65 = vector.broadcast %cst_26 : f32 to vector<8x128xf32>
    %66 = arith.select %63, %64, %65 : vector<8x128xi1>, vector<8x128xf32>
    %c0_27 = arith.constant 0 : index
    %c0_28 = arith.constant 0 : index
    %67 = vector.load %arg5[%c0_27, %c0_28] : memref<8x128xf32, #tpu.memory_space<vmem>>, vector<8x128xf32>
    %68 = arith.addf %67, %60 : vector<8x128xf32>
    %c0_29 = arith.constant 0 : index
    %c0_30 = arith.constant 0 : index
    %69 = vector.load %arg5[%c0_29, %c0_30] : memref<8x128xf32, #tpu.memory_space<vmem>>, vector<8x128xf32>
    tpu.vector_store %arg5[%c0_29, %c0_30], %68 {strides = array<i32>} : memref<8x128xf32, #tpu.memory_space<vmem>>, vector<8x128xf32>,
    %c0_31 = arith.constant 0 : index
    %c0_32 = arith.constant 0 : index
    %70 = vector.load %arg6[%c0_31, %c0_32] : memref<8x128xf32, #tpu.memory_space<vmem>>, vector<8x128xf32>
    %71 = arith.addf %70, %66 : vector<8x128xf32>
    %c0_33 = arith.constant 0 : index
    %c0_34 = arith.constant 0 : index
    %72 = vector.load %arg6[%c0_33, %c0_34] : memref<8x128xf32, #tpu.memory_space<vmem>>, vector<8x128xf32>
    tpu.vector_store %arg6[%c0_33, %c0_34], %71 {strides = array<i32>} : memref<8x128xf32, #tpu.memory_space<vmem>>, vector<8x128xf32>,
    %c0_i32_35 = arith.constant 0 : i32
    %73 = arith.cmpi eq, %arg0, %c0_i32_35 : i32
    %74 = arith.extui %73 : i1 to i32
    %c0_i32_36 = arith.constant 0 : i32
    %75 = arith.cmpi ne, %74, %c0_i32_36 : i32
    scf.if %75 {
      %c0_37 = arith.constant 0 : index
      %c0_38 = arith.constant 0 : index
      %76 = vector.load %arg5[%c0_37, %c0_38] : memref<8x128xf32, #tpu.memory_space<vmem>>, vector<8x128xf32>
      %77 = vector.shape_cast %76 : vector<8x128xf32> to vector<1x8x128xf32>
      %cst_39 = arith.constant dense<0.000000e+00> : vector<1xf32>
      %78 = vector.multi_reduction <add>, %77, %cst_39 [1, 2] : vector<1x8x128xf32> to vector<1xf32>
      %79 = vector.shape_cast %78 : vector<1xf32> to vector<1x1x1xf32>
      %80 = vector.extract %79[0, 0, 0] : f32 from vector<1x1x1xf32>
      %81 = vector.broadcast %80 : f32 to vector<1x1xf32>
      %c0_40 = arith.constant 0 : index
      %c0_41 = arith.constant 0 : index
      %82 = vector.load %arg6[%c0_40, %c0_41] : memref<8x128xf32, #tpu.memory_space<vmem>>, vector<8x128xf32>
      %83 = vector.shape_cast %82 : vector<8x128xf32> to vector<1x8x128xf32>
      %cst_42 = arith.constant dense<0.000000e+00> : vector<1xf32>
      %84 = vector.multi_reduction <add>, %83, %cst_42 [1, 2] : vector<1x8x128xf32> to vector<1xf32>
      %85 = vector.shape_cast %84 : vector<1xf32> to vector<1x1x1xf32>
      %86 = vector.extract %85[0, 0, 0] : f32 from vector<1x1x1xf32>
      %87 = vector.broadcast %86 : f32 to vector<1x1xf32>
      %cst_43 = arith.constant 1.250000e-01 : f32
      %88 = vector.broadcast %cst_43 : f32 to vector<1x1xf32>
      %89 = arith.mulf %81, %88 : vector<1x1xf32>
      %c0_44 = arith.constant 0 : index
      %c0_45 = arith.constant 0 : index
      %90 = vector.load %arg3[%c0_44, %c0_45] : memref<1x1xf32, #tpu.memory_space<vmem>>, vector<1x1xf32>
      tpu.vector_store %arg3[%c0_44, %c0_45], %89 {strides = array<i32>} : memref<1x1xf32, #tpu.memory_space<vmem>>, vector<1x1xf32>,
      %cst_46 = arith.constant 1.250000e-01 : f32
      %91 = vector.broadcast %cst_46 : f32 to vector<1x1xf32>
      %92 = arith.mulf %87, %91 : vector<1x1xf32>
      %c0_47 = arith.constant 0 : index
      %c0_48 = arith.constant 0 : index
      %93 = vector.load %arg4[%c0_47, %c0_48] : memref<1x1xf32, #tpu.memory_space<vmem>>, vector<1x1xf32>
      tpu.vector_store %arg4[%c0_47, %c0_48], %92 {strides = array<i32>} : memref<1x1xf32, #tpu.memory_space<vmem>>, vector<1x1xf32>,
    } else {
    }
    return
  }
  func.func @transform_0(%arg0: i32) -> (i32, i32, i32, i32) {
    %c0_i32 = arith.constant 0 : i32
    %c0_i32_0 = arith.constant 0 : i32
    %c0_i32_1 = arith.constant 0 : i32
    %c0_i32_2 = arith.constant 0 : i32
    return %c0_i32, %arg0, %c0_i32_0, %c0_i32_1 : i32, i32, i32, i32
  }
  func.func @transform_1(%arg0: i32) -> (i32, i32, i32, i32) {
    %c0_i32 = arith.constant 0 : i32
    %c0_i32_0 = arith.constant 0 : i32
    %c0_i32_1 = arith.constant 0 : i32
    %c0_i32_2 = arith.constant 0 : i32
    return %c0_i32, %arg0, %c0_i32_0, %c0_i32_1 : i32, i32, i32, i32
  }
  func.func @transform_2(%arg0: i32) -> (i32, i32) {
    %c0_i32 = arith.constant 0 : i32
    %c0_i32_0 = arith.constant 0 : i32
    %c0_i32_1 = arith.constant 0 : i32
    return %c0_i32, %c0_i32_0 : i32, i32
  }
  func.func @transform_3(%arg0: i32) -> (i32, i32) {
    %c0_i32 = arith.constant 0 : i32
    %c0_i32_0 = arith.constant 0 : i32
    %c0_i32_1 = arith.constant 0 : i32
    return %c0_i32, %c0_i32_0 : i32, i32
  }
}

</mosaic_0001>

<bundles_post_ra>
// kernel: tpu_custom_call.1
= control target key start
LH: loop header
LB: loop body
LE: loop exit
PB: predicated region body
PF: predicated region fallthrough
CT: control target
= control target key end

     0   :  { %9 = vsyncpa [#allocation5], 0  ;;  %s397_s0 = inlined_call_operand.hbm [shape: f32[4,1,8,128], index: 0, kind: input, shape index: {}]   ;;  %s398_s1 = inlined_call_operand.hbm [shape: f32[4,1,8,128], index: 1, kind: input, shape index: {}]   ;;  %s399_s2 = inlined_call_operand.hbm [shape: f32[1,1], index: 2, kind: output, shape index: {0}]   ;;  %s400_s3 = inlined_call_operand.hbm [shape: f32[1,1], index: 3, kind: output, shape index: {1}]  }
   0x1   :  { %10 = vsyncpa [#allocation8], 0 }
   0x2   :  { %11 = vsyncpa [#allocation6], 0 }
   0x3   :  { %12 = vsyncpa [#allocation11], 0  ;;  %s320_s12 = smov [#allocation4]   ;;  %s224_s16 = scalar_lea.hbm %s397_s0, 512 }
   0x4   :  { %s18_s13 = sshll.u32 %s320_s12, 4  ;;  %p225_p0 = scmp.ne.s32.totalorder %s397_s0, %s224_s16  ;;  %s19_s13 = int_to_ptr.vmem [resolvable:$true] %s18_s13 }
   0x5   :  { %p228_p1 = scmp.lt.u32.totalorder %s224_s16, %s397_s0 }
   0x7   :  { %p230_p2 = pnand %p228_p1, %p225_p0 }
   0x9   :  { %233 = shalt.err (!%p230_p2)
}
   0xa   :  { %s234_s21 = scalar_lea.vmem %s19_s13, 512  ;;  %p239_p4 = scmp.lt.s32.totalorder %s19_s13, %s19_s13 }
   0xb   :  { %p235_p3 = scmp.ne.s32.totalorder %s19_s13, %s234_s21  ;;  %p240_p5 = scmp.lt.s32.totalorder %s234_s21, %s234_s21 }
   0xd   :  { %p241_p6 = por %p240_p5, %p239_p4 }
   0xf   :  { %p242_p7 = pnand %p241_p6, %p235_p3 }
  0x11   :  { %245 = shalt.err (!%p242_p7)
}
  0x12   :  { %s321_s22 = smov 128   ;;  %s322_s23 = smov 8  }
  0x13   :  { %24 = dma.hbm_to_vmem [thread:$0]  %s397_s0, 512, %s19_s13, [#allocation5], %s321_s22, %s321_s22, %s322_s23  }
  0x14   :  { %s323_s26 = smov [#allocation7]   ;;  %s246_s30 = scalar_lea.hbm %s398_s1, 512 }
  0x15   :  { %s30_s27 = sshll.u32 %s323_s26, 4  ;;  %p247_p8 = scmp.ne.s32.totalorder %s398_s1, %s246_s30  ;;  %s31_s27 = int_to_ptr.vmem [resolvable:$true] %s30_s27 }
  0x16   :  { %p250_p9 = scmp.lt.u32.totalorder %s246_s30, %s398_s1 }
  0x18   :  { %p252_p10 = pnand %p250_p9, %p247_p8 }
  0x1a   :  { %255 = shalt.err (!%p252_p10)
}
  0x1b   :  { %s256_s8 = scalar_lea.vmem %s31_s27, 512  ;;  %p261_p12 = scmp.lt.s32.totalorder %s31_s27, %s31_s27 }
  0x1c   :  { %p257_p11 = scmp.ne.s32.totalorder %s31_s27, %s256_s8  ;;  %p262_p13 = scmp.lt.s32.totalorder %s256_s8, %s256_s8 }
  0x1e   :  { %p263_p0 = por %p262_p13, %p261_p12 }
  0x20   :  { %p264_p1 = pnand %p263_p0, %p257_p11 }
  0x22   :  { %267 = shalt.err (!%p264_p1)
}
  0x23   :  { %36 = dma.hbm_to_vmem [thread:$0]  %s398_s1, 512, %s31_s27, [#allocation8], %s321_s22, %s321_s22, %s322_s23  }
  0x24   :  { %312 = dma.done.wait [#allocation5], 512  }
  0x25   :  { %313 = vsyncadd [#allocation5], 4294966784 }
  0x26   :  { %314 = dma.done.wait [#allocation8], 512  }
  0x27   :  { %315 = vsyncadd [#allocation8], 4294966784  ;;  %v49_v0 = vld [vmem:[#allocation4] sm:$0xff]  ;;  %v50_v1 = vld [vmem:[#allocation4 + $0x8] sm:$0xff]  ;;  %v57_v54 = vlaneseq  ;;  %s325_s1 = smov [#allocation9]   ;;  %vm171_vm7 = vcmask 0  }
  0x28   :  { %v51_v2 = vld [vmem:[#allocation4 + $0x10] sm:$0xff]  ;;  %v105_v3 = vmul.f32 %v49_v0, %v49_v0  ;;  %v106_v4 = vmul.f32 %v50_v1, %v50_v1  ;;  %v53_v5 = vld [vmem:[#allocation7] sm:$0xff]  ;;  %v52_v7 = vld [vmem:[#allocation4 + $0x18] sm:$0xff]  ;;  %s181_s10 = sshll.u32 %s325_s1, 4  ;;  %s326_s12 = smov [#allocation10]   ;;  %s182_s10 = int_to_ptr.vmem [resolvable:$true] %s181_s10 }
  0x29   :  { %v107_v6 = vmul.f32 %v51_v2, %v51_v2  ;;  %v54_v8 = vld [vmem:[#allocation7 + $0x8] sm:$0xff]  ;;  %v55_v9 = vld [vmem:[#allocation7 + $0x10] sm:$0xff]  ;;  %v112_v11 = vmul.f32 %v53_v5, %v53_v5  ;;  %v56_v12 = vld [vmem:[#allocation7 + $0x18] sm:$0xff]  ;;  %v108_v13 = vmul.f32 %v52_v7, %v52_v7  ;;  %v98_v21 = vmul.f32 %v53_v5, %v49_v0  ;;  %s191_s13 = sshll.u32 %s326_s12, 4  ;;  %s268_s15 = scalar_lea.vmem %s182_s10, 16  ;;  %s192_s13 = int_to_ptr.vmem [resolvable:$true] %s191_s13 }
  0x2a   :  { %v109_v10 = vadd.f32 %v106_v4, %v105_v3  ;;  %v113_v15 = vmul.f32 %v54_v8, %v54_v8  ;;  %v114_v16 = vmul.f32 %v55_v9, %v55_v9  ;;  %v115_v17 = vmul.f32 %v56_v12, %v56_v12  ;;  %p269_p2 = scmp.ne.s32.totalorder %s182_s10, %s268_s15  ;;  %s272_s16 = scalar_lea.vmem %s182_s10, 32 }
  0x2b   :  { %v99_v22 = vmul.f32 %v54_v8, %v50_v1  ;;  %v100_v25 = vmul.f32 %v55_v9, %v51_v2  ;;  %v67_v27 = vsub.f32 %v49_v0, %v53_v5  ;;  %v68_v28 = vsub.f32 %v50_v1, %v54_v8  ;;  %p273_p3 = scmp.lt.s32.totalorder %s182_s10, %s182_s10  ;;  %p274_p4 = scmp.lt.s32.totalorder %s272_s16, %s268_s15 }
  0x2c   :  { %v110_v14 = vadd.f32 %v109_v10, %v107_v6  ;;  %v116_v18 = vadd.f32 %v113_v15, %v112_v11  ;;  %v69_v30 = vsub.f32 %v51_v2, %v55_v9  ;;  %v101_v31 = vmul.f32 %v56_v12, %v52_v7 }
  0x2d   :  { %v102_v26 = vadd.f32 %v99_v22, %v98_v21  ;;  %v71_v33 = vand.u32 2147483647, %v67_v27  ;;  %v72_v34 = vand.u32 2147483647, %v68_v28  ;;  %v79_v35 = vmul.f32 0.5, %v67_v27  ;;  %p275_p5 = por %p274_p4, %p273_p3 }
  0x2e   :  { %v111_v19 = vadd.f32 %v110_v14, %v108_v13  ;;  %v117_v20 = vadd.f32 %v116_v18, %v114_v16  ;;  %v80_v36 = vmul.f32 0.5, %v68_v28  ;;  %v70_v37 = vsub.f32 %v52_v7, %v56_v12 }
  0x2f   :  { %v103_v32 = vadd.f32 %v102_v26, %v100_v25  ;;  %v73_v38 = vand.u32 2147483647, %v69_v30  ;;  %v81_v39 = vmul.f32 0.5, %v69_v30  ;;  %v83_v41 = vmul.f32 %v79_v35, %v67_v27  ;;  %p276_p6 = pnand %p275_p5, %p269_p2 }
  0x30   :  { %v118_v23 = vadd.f32 %v117_v20, %v115_v17  ;;  %v84_v42 = vmul.f32 %v80_v36, %v68_v28  ;;  %v205_v43 = vadd.f32 -0.5, %v71_v33  ;;  %v206_v44 = vadd.f32 -0.5, %v72_v34 }
  0x31   :  { %v104_v40 = vadd.f32 %v103_v32, %v101_v31  ;;  %vm75_vm0 = vcmp.lt.f32.partialorder %v71_v33, 1.0  ;;  %vm76_vm1 = vcmp.lt.f32.partialorder %v72_v34, 1.0  ;;  %v74_v45 = vand.u32 2147483647, %v70_v37 }
  0x32   :  { %v119_v24 = vmul.f32 %v118_v23, %v111_v19  ;;  %v82_v46 = vmul.f32 0.5, %v70_v37  ;;  %v85_v49 = vmul.f32 %v81_v39, %v69_v30  ;;  %v207_v50 = vadd.f32 -0.5, %v73_v38 }
  0x33   :  { %v125_v47 = vmul.f32 %v104_v40, %v104_v40  ;;  %v91_v51 = vsel %vm75_vm0, %v83_v41, %v205_v43  ;;  %v92_v52 = vsel %vm76_vm1, %v84_v42, %v206_v44  ;;  %vm77_vm2 = vcmp.lt.f32.partialorder %v73_v38, 1.0 }
  0x34   :  { %v120_v29 = vmax.f32 %v119_v24, 1e-24  ;;  %v95_v55 = vadd.f32 %v92_v52, %v91_v51  ;;  %v86_v58 = vmul.f32 %v82_v46, %v70_v37  ;;  %v208_v59 = vadd.f32 -0.5, %v74_v45 }
  0x35   :  { %v126_v57 = vmul.f32 4.0, %v125_v47  ;;  %v93_v60 = vsel %vm77_vm2, %v85_v49, %v207_v50  ;;  %vm78_vm3 = vcmp.lt.f32.partialorder %v74_v45, 1.0  ;;  %v58_v62 = vshrl.u32 %v57_v54, 7 }
  0x36   :  { %222 = vrcp.f32 %v120_v29  ;;  %v96_v63 = vadd.f32 %v95_v55, %v93_v60  ;;  %v94_v1 = vsel %vm78_vm3, %v86_v58, %v208_v59  ;;  %v60_v3 = vand.u32 127, %v57_v54 }
  0x37   :  { %v62_v4 = vmul.u32 128, %v58_v62  ;;  %v324_v14 = vmov 0.0  }
  0x38   :  { %v97_v5 = vadd.f32 %v96_v63, %v94_v1 }
  0x39   :  { %v65_v8 = vadd.s32 %v62_v4, %v60_v3 }
  0x3a   :  { %v133_v10 = vmul.f32 0.25, %v97_v5 }
  0x3b   :  { %vm66_vm4 = vcmp.lt.s32.totalorder %v65_v8, 8 }
  0x40   :  { %v223_v48 = vpop.eup %222 }
  0x41   :  { %v122_v53 = vmul.f32 %v223_v48, %v120_v29 }
  0x43   :  { %v123_v56 = vsub.f32 2.0, %v122_v53 }
  0x45   :  { %v124_v61 = vmul.f32 %v223_v48, %v123_v56 }
  0x47   :  { %v127_v0 = vmul.f32 %v126_v57, %v124_v61 }
  0x49   :  { %v209_v2 = vadd.f32 -1.0, %v127_v0 }
  0x4b   :  { %v129_v6 = vmax.f32 %v209_v2, -1.0001 }
  0x4d   :  { %v130_v7 = vmin.f32 %v129_v6, 3.0001 }
  0x4f   :  { %v210_v9 = vadd.f32 -1.0, %v130_v7 }
  0x51   :  { %v132_v11 = vmul.f32 0.5, %v210_v9 }
  0x53   :  { %v134_v12 = vsub.f32 %v133_v10, %v132_v11  ;;  %vm136_vm5 = vcmp.gt.f32.partialorder %v132_v11, 0.8660254 }
  0x54   :  { %vm137_vm6 = vmand %vm66_vm4, %vm136_vm5 }
  0x55   :  { %v135_v13 = vsel %vm66_vm4, %v134_v12, 0.0  ;;  %v138_v15 = vsel %vm137_vm6, 1.0, %v324_v14 }
  0x56   :  { %149 = vadd.xlane.f32.xlu0 %v135_v13 }
  0x5a   :  { %160 = vadd.xlane.f32.xlu0 %v138_v15 }
  0xe3   :  { %v150_v16 = vpop.xlane.xlu0 %149 }
  0xe4   :  { %v151_v17 = vrot.slane %v150_v16, 4 }
  0xe6   :  { %v152_v18 = vadd.f32 %v151_v17, %v150_v16 }
  0xe7   :  { %v161_v19 = vpop.xlane.xlu0 %160 }
  0xe8   :  { %v153_v20 = vrot.slane %v152_v18, 2  ;;  %v162_v21 = vrot.slane %v161_v19, 4 }
  0xea   :  { %v163_v22 = vadd.f32 %v162_v21, %v161_v19  ;;  %v154_v23 = vadd.f32 %v153_v20, %v152_v18 }
  0xec   :  { %v164_v24 = vrot.slane %v163_v22, 2  ;;  %v155_v25 = vrot.slane %v154_v23, 1 }
  0xee   :  { %v165_v26 = vadd.f32 %v164_v24, %v163_v22  ;;  %v156_v27 = vadd.f32 %v155_v25, %v154_v23 }
  0xf0   :  { %211 = vpush %v156_v27  ;;  %v166_v28 = vrot.slane %v165_v26, 1 }
  0xf2   :  { %v167_v29 = vadd.f32 %v166_v28, %v165_v26 }
  0xf4   :  { %213 = vpush %v167_v29 }
 0x121   :  { %s212_s11 = spop %211 }
 0x122   :  { %v158_v30 = vstv %s212_s11 }
 0x123   :  { %v170_v31 = vmul.f32 0.125, %v158_v30 }
 0x125   :  { %s214_s14 = spop %213  ;;  %172 = vst.msk [vmem:[#allocation9] sm:$0x1] %vm171_vm7, %v170_v31 }
 0x126   :  { %v169_v32 = vstv %s214_s14 }
 0x127   :  { %279 = shalt.err (!%p276_p6)
}
 0x128   :  { %s280_s19 = scalar_lea.hbm %s399_s2, 16 }
 0x129   :  { %p281_p7 = scmp.ne.s32.totalorder %s399_s2, %s280_s19  ;;  %p284_p8 = scmp.lt.u32.totalorder %s280_s19, %s399_s2 }
 0x12b   :  { %p286_p9 = pnand %p284_p8, %p281_p7 }
 0x12d   :  { %289 = shalt.err (!%p286_p9)
}
 0x12e   :  { %184 = dma.vmem_to_hbm [thread:$0]  %s182_s10, 16, %s399_s2, [#allocation6]   ;;  %v173_v33 = vmul.f32 0.125, %v169_v32 }
 0x12f   :  { %s290_s26 = scalar_lea.vmem %s192_s13, 16  ;;  %s294_s27 = scalar_lea.vmem %s192_s13, 32 }
 0x130   :  { %174 = vst.msk [vmem:[#allocation10] sm:$0x1] %vm171_vm7, %v173_v33  ;;  %p291_p10 = scmp.ne.s32.totalorder %s192_s13, %s290_s26  ;;  %p295_p11 = scmp.lt.s32.totalorder %s192_s13, %s192_s13 }
 0x131   :  { %p296_p12 = scmp.lt.s32.totalorder %s294_s27, %s290_s26 }
 0x133   :  { %p297_p13 = por %p296_p12, %p295_p11 }
 0x135   :  { %p298_p0 = pnand %p297_p13, %p291_p10 }
 0x137   :  { %301 = shalt.err (!%p298_p0)
}
 0x138   :  { %s302_s30 = scalar_lea.hbm %s400_s3, 16 }
 0x139   :  { %p303_p1 = scmp.ne.s32.totalorder %s400_s3, %s302_s30  ;;  %p306_p2 = scmp.lt.u32.totalorder %s302_s30, %s400_s3 }
 0x13b   :  { %p308_p3 = pnand %p306_p2, %p303_p1 }
 0x13d   :  { %311 = shalt.err (!%p308_p3)
}
 0x13e   :  { %194 = dma.vmem_to_hbm [thread:$0]  %s192_s13, 16, %s400_s3, [#allocation11]  }
 0x13f   :  { %316 = dma.done.wait [#allocation6], 16  }
 0x140   :  { %317 = vsyncadd [#allocation6], 4294967280 }
 0x141   :  { %318 = dma.done.wait [#allocation11], 16  }
 0x142   :  { %319 = vsyncadd [#allocation11], 4294967280 }
 0x143   :  { %201 = vsyncpa [#allocation5], 1 }
 0x144   :  { %202 = vsyncpa [#allocation8], 1 }
 0x145   :  { %203 = vsyncpa [#allocation6], 1 }
 0x146   :  { %204 = vsyncpa [#allocation11], 1 }

</bundles_post_ra>
